<compile_context>
chip_gen: v6e
topology: v6e:2x2x1
jax: 0.10.0
libtpu: 0.0.40
codegen_flags: <defaults>
</compile_context>

<pallas_src>
import functools

import jax
import jax.numpy as jnp
from jax.experimental import pallas as pl
from jax.experimental.pallas import tpu as pltpu


def _round_up(x, m):
    return ((x + m - 1) // m) * m


def _head_kernel(x_ref, w_ref, b_ref, o_ref, *, inv_hw):
    # x_ref: (bn, HW, C) channels-last tile (C on lanes -> lane-dense loads)
    # w_ref: (C, Kp)   b_ref: (1, Kp)   o_ref: (bn, Kp)
    # Sublane-axis sum with f32 accumulation; no full-tile f32 materialization.
    pooled = jnp.sum(x_ref[...], axis=1, dtype=jnp.float32)        # (bn, C)
    pooled = pooled * inv_hw                                        # mean scale on the small tensor
    logits = jnp.dot(pooled, w_ref[...].astype(jnp.float32),
                     preferred_element_type=jnp.float32)            # MXU, C already on lanes
    o_ref[...] = (logits + b_ref[...].astype(jnp.float32)).astype(o_ref.dtype)


def _pick_batch_tile(n, bytes_per_batch_row, budget_bytes):
    # Output block is (bn, Kp): bn must be a multiple of 8 or equal to full N.
    cands = [d for d in range(1, n + 1) if n % d == 0 and (d == n or d % 8 == 0)]
    fitting = [d for d in cands if d * bytes_per_batch_row <= budget_bytes]
    return max(fitting) if fitting else min(cands)


def base_head_forward(x_nchw, weight, bias, *,
                      x_block_budget_bytes=4 * 1024 * 1024,
                      vmem_limit_bytes=None):
    """Global-average-pool + linear classifier (canonical BaseHead forward).

    x_nchw: (N, C, H, W)  weight: (C, num_classes)  bias: (num_classes,)

    x_block_budget_bytes / vmem_limit_bytes let callers re-derive tile budgets
    per generation (v5e 16 MiB scoped default, v6e/v7x 32 MiB); the defaults
    are safe on all three.
    """
    n, c, h, w = x_nchw.shape
    hw = h * w
    num_classes = weight.shape[1]

    # Channels-last glue: C on lanes => lane-dense loads, sublane reduce, and no
    # relayout before the MXU.  (A real backbone should emit NHWC directly; the
    # transpose here is only for PyTorch NCHW parity.)
    x_nhwc = jnp.transpose(x_nchw, (0, 2, 3, 1)).reshape(n, hw, c)

    # Pad the classifier to a lane-dense multiple of 128 (unmasked vector
    # stores); slice back after the call.
    kp = _round_up(max(num_classes, 128), 128)
    if kp != num_classes:
        weight_p = jnp.pad(weight, ((0, 0), (0, kp - num_classes)))
        bias_p = jnp.pad(bias, (0, kp - num_classes))
    else:
        weight_p, bias_p = weight, bias
    b2d = bias_p.reshape(1, kp)

    bytes_per_batch_row = hw * c * x_nhwc.dtype.itemsize
    bn = _pick_batch_tile(n, bytes_per_batch_row, x_block_budget_bytes)
    grid = (n // bn,)

    kernel = functools.partial(_head_kernel, inv_hw=1.0 / float(hw))

    out_p = pl.pallas_call(
        kernel,
        out_shape=jax.ShapeDtypeStruct((n, kp), jnp.float32),
        grid_spec=pltpu.PrefetchScalarGridSpec(
            num_scalar_prefetch=0,
            grid=grid,
            in_specs=[
                pl.BlockSpec((bn, hw, c), lambda i: (i, 0, 0)),
                pl.BlockSpec((c, kp), lambda i: (0, 0)),     # resident across grid
                pl.BlockSpec((1, kp), lambda i: (0, 0)),     # resident across grid
            ],
            out_specs=pl.BlockSpec((bn, kp), lambda i: (i, 0)),
        ),
        compiler_params=pltpu.CompilerParams(
            dimension_semantics=("parallel",),               # shard batch over v7x TCs
            vmem_limit_bytes=vmem_limit_bytes),
    )(x_nhwc, weight_p, b2d)

    return out_p[:, :num_classes]


if __name__ == "__main__":
    # Small shapes consistent with a classification head:
    #   batch N=2, in_channels C=32, spatial 16x16, num_classes=10
    N, C, H, W = 2, 32, 16, 16
    NUM_CLASSES = 10

    key = jax.random.PRNGKey(0)
    kx, kw, kb = jax.random.split(key, 3)

    x = jax.random.normal(kx, (N, C, H, W), dtype=jnp.float32)
    # Deterministic param init (nn.Linear-style scale ~ 1/sqrt(fan_in)).
    weight = jax.random.normal(kw, (C, NUM_CLASSES), dtype=jnp.float32) / jnp.sqrt(C)
    bias = jax.random.normal(kb, (NUM_CLASSES,), dtype=jnp.float32) * 0.01

    out = base_head_forward(x, weight, bias)
    out = jax.block_until_ready(out)

    # Pure-JAX reference check of the same forward semantics.
    ref = jnp.mean(x.reshape(N, C, H * W), axis=-1) @ weight + bias
    assert out.shape == (N, NUM_CLASSES)
    assert jnp.allclose(out, ref, atol=1e-4, rtol=1e-4), "mismatch vs reference"

    print("KERNEL_OK")
</pallas_src>

<mosaic_0001>
module attributes {stable_mosaic.version = 11 : i64} {
  func.func @_head_kernel(%arg0: i32, %arg1: memref<2x256x32xf32, #tpu.memory_space<vmem>>, %arg2: memref<32x128xf32, #tpu.memory_space<vmem>>, %arg3: memref<1x128xf32, #tpu.memory_space<vmem>>, %arg4: memref<2x128xf32, #tpu.memory_space<vmem>>) attributes {dimension_semantics = [#tpu.dimension_semantics<parallel>], iteration_bounds = array<i64: 1>, scalar_prefetch = 0 : i64, scratch_operands = 0 : i64, tpu.core_type = #tpu.core_type<tc>, window_params = [{transform_indices = @transform_0, window_bounds = array<i64: 2, 256, 32>}, {pipeline_mode = #tpu.pipeline_mode<synchronous>, transform_indices = @transform_1, window_bounds = array<i64: 32, 128>}, {pipeline_mode = #tpu.pipeline_mode<synchronous>, transform_indices = @transform_2, window_bounds = array<i64: 1, 128>}, {transform_indices = @transform_3, window_bounds = array<i64: 2, 128>}]} {
    %c0 = arith.constant 0 : index
    %c0_0 = arith.constant 0 : index
    %c0_1 = arith.constant 0 : index
    %0 = vector.load %arg1[%c0, %c0_0, %c0_1] : memref<2x256x32xf32, #tpu.memory_space<vmem>>, vector<2x256x32xf32>
    %cst = arith.constant dense<0.000000e+00> : vector<2x32xf32>
    %1 = vector.multi_reduction <add>, %0, %cst [1] : vector<2x256x32xf32> to vector<2x32xf32>
    %cst_2 = arith.constant 3.906250e-03 : f32
    %2 = vector.broadcast %cst_2 : f32 to vector<2x32xf32>
    %3 = arith.mulf %1, %2 : vector<2x32xf32>
    %c0_3 = arith.constant 0 : index
    %c0_4 = arith.constant 0 : index
    %4 = vector.load %arg2[%c0_3, %c0_4] : memref<32x128xf32, #tpu.memory_space<vmem>>, vector<32x128xf32>
    %cst_5 = arith.constant dense<0.000000e+00> : vector<2x128xf32>
    %5 = tpu.matmul %3, %4, %cst_5 {dimension_numbers = #tpu.dot_dimension_numbers<[1], [0], [0], [1], [0, 0, 1, 1], [], []>} : vector<2x32xf32>, vector<32x128xf32>, vector<2x128xf32> -> vector<2x128xf32>
    %c0_6 = arith.constant 0 : index
    %c0_7 = arith.constant 0 : index
    %6 = vector.load %arg3[%c0_6, %c0_7] : memref<1x128xf32, #tpu.memory_space<vmem>>, vector<1x128xf32>
    %7 = vector.broadcast %6 : vector<1x128xf32> to vector<2x128xf32>
    %8 = arith.addf %5, %7 : vector<2x128xf32>
    %c0_8 = arith.constant 0 : index
    %c0_9 = arith.constant 0 : index
    %9 = vector.load %arg4[%c0_8, %c0_9] : memref<2x128xf32, #tpu.memory_space<vmem>>, vector<2x128xf32>
    tpu.vector_store %arg4[%c0_8, %c0_9], %8 {strides = array<i32>} : memref<2x128xf32, #tpu.memory_space<vmem>>, vector<2x128xf32>,
    return
  }
  func.func @transform_0(%arg0: i32) -> (i32, i32, i32) {
    %c0_i32 = arith.constant 0 : i32
    %c0_i32_0 = arith.constant 0 : i32
    %c0_i32_1 = arith.constant 0 : i32
    return %arg0, %c0_i32, %c0_i32_0 : i32, i32, i32
  }
  func.func @transform_1(%arg0: i32) -> (i32, i32) {
    %c0_i32 = arith.constant 0 : i32
    %c0_i32_0 = arith.constant 0 : i32
    %c0_i32_1 = arith.constant 0 : i32
    return %c0_i32, %c0_i32_0 : i32, i32
  }
  func.func @transform_2(%arg0: i32) -> (i32, i32) {
    %c0_i32 = arith.constant 0 : i32
    %c0_i32_0 = arith.constant 0 : i32
    %c0_i32_1 = arith.constant 0 : i32
    return %c0_i32, %c0_i32_0 : i32, i32
  }
  func.func @transform_3(%arg0: i32) -> (i32, i32) {
    %c0_i32 = arith.constant 0 : i32
    %c0_i32_0 = arith.constant 0 : i32
    return %arg0, %c0_i32 : i32, i32
  }
}

</mosaic_0001>

<bundles_post_ra>
// kernel: tpu_custom_call.1
= control target key start
LH: loop header
LB: loop body
LE: loop exit
PB: predicated region body
PF: predicated region fallthrough
CT: control target
= control target key end

     0   :  { %vm79_vm0 = vcmask 261120   ;;  %v365_v1 = vmov 0.0   ;;  %vm366_vm1 = vmmov 0   ;;  %s663_s0 = inlined_call_operand.vmem [shape: f32[2,256,32], index: 0, kind: input, shape index: {}]   ;;  %s664_s1 = inlined_call_operand.vmem [shape: f32[32,128], index: 1, kind: input, shape index: {}]   ;;  %s665_s2 = inlined_call_operand.vmem [shape: f32[1,128], index: 2, kind: input, shape index: {}]   ;;  %s666_s3 = inlined_call_operand.hbm [shape: f32[2,128], index: 3, kind: output, shape index: {}]  }
   0x1   :  { %v223_v0 = vld [vmem:[%s664_s1 + $0x18] sm:$0xff]  ;;  %329 = vmatprep.subr.mxu0 %v365_v1  ;;  %v222_v2 = vld [vmem:[%s664_s1 + $0x10] sm:$0xff]  ;;  %337 = vmatprep.mubr.msk.f32.mxu0 %vm366_vm1, %v365_v1  ;;  %v15_v3 = vld [vmem:[%s663_s0] sm:$0xff] }
   0x2   :  { %v16_v4 = vld [vmem:[%s663_s0 + $0x8] sm:$0xff]  ;;  %330 = vmatpush3.msra.mxu0 %v223_v0  ;;  %v17_v5 = vld [vmem:[%s663_s0 + $0x10] sm:$0xff]  ;;  %v18_v6 = vld [vmem:[%s663_s0 + $0x18] sm:$0xff]  ;;  %v80_v7 = vsel %vm79_vm0, %v15_v3, 0.0 }
   0x3   :  { %v81_v8 = vsel %vm79_vm0, %v16_v4, 0.0  ;;  %331 = vmatprep.subr.mxu0 %v365_v1  ;;  %v221_v9 = vld [vmem:[%s664_s1 + $0x8] sm:$0xff]  ;;  %v19_v10 = vld [vmem:[%s663_s0 + $0x20] sm:$0xff]  ;;  %v83_v12 = vsel %vm79_vm0, %v17_v5, 0.0  ;;  %v85_v13 = vsel %vm79_vm0, %v18_v6, 0.0  ;;  %v21_v18 = vld [vmem:[%s663_s0 + $0x30] sm:$0xff] }
   0x4   :  { %v82_v11 = vadd.f32 %v81_v8, %v80_v7  ;;  %332 = vmatpush3.msra.mxu0 %v222_v2  ;;  %v220_v14 = vld [vmem:[%s664_s1] sm:$0xff]  ;;  %v20_v15 = vld [vmem:[%s663_s0 + $0x28] sm:$0xff]  ;;  %v87_v17 = vsel %vm79_vm0, %v19_v10, 0.0  ;;  %v22_v21 = vld [vmem:[%s663_s0 + $0x38] sm:$0xff]  ;;  %v91_v23 = vsel %vm79_vm0, %v21_v18, 0.0 }
   0x5   :  { %333 = vmatprep.subr.mxu0 %v365_v1  ;;  %v89_v20 = vsel %vm79_vm0, %v20_v15, 0.0  ;;  %v23_v24 = vld [vmem:[%s663_s0 + $0x40] sm:$0xff]  ;;  %v48_v27 = vld [vmem:[%s663_s0 + $0x108] sm:$0xff]  ;;  %v49_v28 = vld [vmem:[%s663_s0 + $0x110] sm:$0xff]  ;;  %v93_v29 = vsel %vm79_vm0, %v22_v21, 0.0 }
   0x6   :  { %v84_v16 = vadd.f32 %v83_v12, %v82_v11  ;;  %334 = vmatpush3.msra.mxu0 %v221_v9  ;;  %v47_v26 = vld [vmem:[%s663_s0 + $0x100] sm:$0xff]  ;;  %v24_v30 = vld [vmem:[%s663_s0 + $0x48] sm:$0xff]  ;;  %v50_v31 = vld [vmem:[%s663_s0 + $0x118] sm:$0xff]  ;;  %v150_v34 = vsel %vm79_vm0, %v48_v27, 0.0  ;;  %v152_v35 = vsel %vm79_vm0, %v49_v28, 0.0  ;;  %v95_v37 = vsel %vm79_vm0, %v23_v24, 0.0 }
   0x7   :  { %335 = vmatprep.subr.mxu0 %v365_v1  ;;  %v149_v33 = vsel %vm79_vm0, %v47_v26, 0.0  ;;  %v51_v36 = vld [vmem:[%s663_s0 + $0x120] sm:$0xff]  ;;  %v25_v39 = vld [vmem:[%s663_s0 + $0x50] sm:$0xff]  ;;  %v154_v41 = vsel %vm79_vm0, %v50_v31, 0.0  ;;  %v52_v42 = vld [vmem:[%s663_s0 + $0x128] sm:$0xff]  ;;  %v97_v43 = vsel %vm79_vm0, %v24_v30, 0.0 }
   0x8   :  { %v86_v19 = vadd.f32 %v85_v13, %v84_v16  ;;  %336 = vmatpush3.msra.mxu0 %v220_v14  ;;  %v151_v38 = vadd.f32 %v150_v34, %v149_v33  ;;  %v26_v45 = vld [vmem:[%s663_s0 + $0x58] sm:$0xff]  ;;  %v156_v47 = vsel %vm79_vm0, %v51_v36, 0.0  ;;  %v53_v48 = vld [vmem:[%s663_s0 + $0x130] sm:$0xff]  ;;  %v99_v49 = vsel %vm79_vm0, %v25_v39, 0.0  ;;  %v27_v51 = vld [vmem:[%s663_s0 + $0x60] sm:$0xff] }
   0x9   :  { %v158_v53 = vsel %vm79_vm0, %v52_v42, 0.0  ;;  %v54_v54 = vld [vmem:[%s663_s0 + $0x138] sm:$0xff]  ;;  %v101_v55 = vsel %vm79_vm0, %v26_v45, 0.0  ;;  %v28_v57 = vld [vmem:[%s663_s0 + $0x68] sm:$0xff]  ;;  %v160_v59 = vsel %vm79_vm0, %v53_v48, 0.0  ;;  %v55_v60 = vld [vmem:[%s663_s0 + $0x140] sm:$0xff] }
   0xa   :  { %v88_v22 = vadd.f32 %v87_v17, %v86_v19  ;;  %v153_v44 = vadd.f32 %v152_v35, %v151_v38  ;;  %v103_v61 = vsel %vm79_vm0, %v27_v51, 0.0  ;;  %v29_v63 = vld [vmem:[%s663_s0 + $0x70] sm:$0xff]  ;;  %v162_v1 = vsel %vm79_vm0, %v54_v54, 0.0 }
   0xc   :  { %v90_v25 = vadd.f32 %v89_v20, %v88_v22  ;;  %v155_v50 = vadd.f32 %v154_v41, %v153_v44 }
   0xe   :  { %v92_v32 = vadd.f32 %v91_v23, %v90_v25  ;;  %v157_v56 = vadd.f32 %v156_v47, %v155_v50 }
  0x10   :  { %v94_v40 = vadd.f32 %v93_v29, %v92_v32  ;;  %v159_v62 = vadd.f32 %v158_v53, %v157_v56 }
  0x12   :  { %v96_v46 = vadd.f32 %v95_v37, %v94_v40 }
  0x14   :  { %v98_v52 = vadd.f32 %v97_v43, %v96_v46 }
  0x16   :  { %v100_v58 = vadd.f32 %v99_v49, %v98_v52 }
  0x18   :  { %v102_v0 = vadd.f32 %v101_v55, %v100_v58 }
  0x19   :  { %8 = vsyncpa [#allocation3], 0  ;;  %v56_v2 = vld [vmem:[%s663_s0 + $0x148] sm:$0xff]  ;;  %v105_v3 = vsel %vm79_vm0, %v28_v57, 0.0  ;;  %v161_v4 = vadd.f32 %v160_v59, %v159_v62  ;;  %v30_v5 = vld [vmem:[%s663_s0 + $0x78] sm:$0xff]  ;;  %v164_v7 = vsel %vm79_vm0, %v55_v60, 0.0 }
  0x1a   :  { %v104_v6 = vadd.f32 %v103_v61, %v102_v0  ;;  %v57_v8 = vld [vmem:[%s663_s0 + $0x150] sm:$0xff]  ;;  %v107_v9 = vsel %vm79_vm0, %v29_v63, 0.0  ;;  %v31_v11 = vld [vmem:[%s663_s0 + $0x80] sm:$0xff]  ;;  %v166_v13 = vsel %vm79_vm0, %v56_v2, 0.0  ;;  %v58_v14 = vld [vmem:[%s663_s0 + $0x158] sm:$0xff]  ;;  %v109_v15 = vsel %vm79_vm0, %v30_v5, 0.0 }
  0x1b   :  { %v163_v10 = vadd.f32 %v162_v1, %v161_v4  ;;  %v32_v17 = vld [vmem:[%s663_s0 + $0x88] sm:$0xff]  ;;  %v168_v19 = vsel %vm79_vm0, %v57_v8, 0.0  ;;  %v59_v20 = vld [vmem:[%s663_s0 + $0x160] sm:$0xff]  ;;  %v111_v21 = vsel %vm79_vm0, %v31_v11, 0.0  ;;  %v33_v23 = vld [vmem:[%s663_s0 + $0x90] sm:$0xff]  ;;  %v170_v25 = vsel %vm79_vm0, %v58_v14, 0.0 }
  0x1c   :  { %v106_v12 = vadd.f32 %v105_v3, %v104_v6  ;;  %v60_v26 = vld [vmem:[%s663_s0 + $0x168] sm:$0xff]  ;;  %v113_v27 = vsel %vm79_vm0, %v32_v17, 0.0  ;;  %v34_v29 = vld [vmem:[%s663_s0 + $0x98] sm:$0xff]  ;;  %v172_v31 = vsel %vm79_vm0, %v59_v20, 0.0  ;;  %v61_v32 = vld [vmem:[%s663_s0 + $0x170] sm:$0xff]  ;;  %v115_v33 = vsel %vm79_vm0, %v33_v23, 0.0 }
  0x1d   :  { %v165_v16 = vadd.f32 %v164_v7, %v163_v10  ;;  %v35_v35 = vld [vmem:[%s663_s0 + $0xa0] sm:$0xff]  ;;  %v174_v37 = vsel %vm79_vm0, %v60_v26, 0.0  ;;  %v62_v38 = vld [vmem:[%s663_s0 + $0x178] sm:$0xff]  ;;  %v117_v39 = vsel %vm79_vm0, %v34_v29, 0.0  ;;  %v36_v41 = vld [vmem:[%s663_s0 + $0xa8] sm:$0xff]  ;;  %v176_v43 = vsel %vm79_vm0, %v61_v32, 0.0 }
  0x1e   :  { %v108_v18 = vadd.f32 %v107_v9, %v106_v12  ;;  %v63_v44 = vld [vmem:[%s663_s0 + $0x180] sm:$0xff]  ;;  %v119_v45 = vsel %vm79_vm0, %v35_v35, 0.0  ;;  %v37_v47 = vld [vmem:[%s663_s0 + $0xb0] sm:$0xff]  ;;  %v178_v49 = vsel %vm79_vm0, %v62_v38, 0.0  ;;  %v64_v50 = vld [vmem:[%s663_s0 + $0x188] sm:$0xff]  ;;  %v121_v51 = vsel %vm79_vm0, %v36_v41, 0.0 }
  0x1f   :  { %v167_v22 = vadd.f32 %v166_v13, %v165_v16  ;;  %v38_v53 = vld [vmem:[%s663_s0 + $0xb8] sm:$0xff]  ;;  %v180_v55 = vsel %vm79_vm0, %v63_v44, 0.0  ;;  %v65_v56 = vld [vmem:[%s663_s0 + $0x190] sm:$0xff]  ;;  %v123_v57 = vsel %vm79_vm0, %v37_v47, 0.0  ;;  %v39_v59 = vld [vmem:[%s663_s0 + $0xc0] sm:$0xff]  ;;  %v182_v61 = vsel %vm79_vm0, %v64_v50, 0.0 }
  0x20   :  { %v110_v24 = vadd.f32 %v109_v15, %v108_v18  ;;  %v66_v62 = vld [vmem:[%s663_s0 + $0x198] sm:$0xff]  ;;  %v125_v63 = vsel %vm79_vm0, %v38_v53, 0.0  ;;  %v40_v1 = vld [vmem:[%s663_s0 + $0xc8] sm:$0xff]  ;;  %v184_v3 = vsel %vm79_vm0, %v65_v56, 0.0  ;;  %v67_v4 = vld [vmem:[%s663_s0 + $0x1a0] sm:$0xff]  ;;  %v127_v5 = vsel %vm79_vm0, %v39_v59, 0.0 }
  0x21   :  { %v169_v28 = vadd.f32 %v168_v19, %v167_v22  ;;  %v41_v7 = vld [vmem:[%s663_s0 + $0xd0] sm:$0xff]  ;;  %v186_v9 = vsel %vm79_vm0, %v66_v62, 0.0  ;;  %v68_v10 = vld [vmem:[%s663_s0 + $0x1a8] sm:$0xff]  ;;  %v129_v11 = vsel %vm79_vm0, %v40_v1, 0.0  ;;  %v42_v13 = vld [vmem:[%s663_s0 + $0xd8] sm:$0xff]  ;;  %v188_v15 = vsel %vm79_vm0, %v67_v4, 0.0 }
  0x22   :  { %v112_v30 = vadd.f32 %v111_v21, %v110_v24  ;;  %v69_v16 = vld [vmem:[%s663_s0 + $0x1b0] sm:$0xff]  ;;  %v131_v17 = vsel %vm79_vm0, %v41_v7, 0.0  ;;  %v43_v19 = vld [vmem:[%s663_s0 + $0xe0] sm:$0xff]  ;;  %v190_v21 = vsel %vm79_vm0, %v68_v10, 0.0  ;;  %v70_v22 = vld [vmem:[%s663_s0 + $0x1b8] sm:$0xff]  ;;  %v133_v23 = vsel %vm79_vm0, %v42_v13, 0.0 }
  0x23   :  { %v171_v34 = vadd.f32 %v170_v25, %v169_v28  ;;  %v44_v25 = vld [vmem:[%s663_s0 + $0xe8] sm:$0xff]  ;;  %v71_v28 = vld [vmem:[%s663_s0 + $0x1c0] sm:$0xff]  ;;  %v135_v29 = vsel %vm79_vm0, %v43_v19, 0.0  ;;  %v78_v62 = vld [vmem:[%s663_s0 + $0x1f8] sm:$0xff]  ;;  %vm233_vm2 = vcmask 1041409   ;;  %s367_s9 = smov [#allocation2]  }
  0x24   :  { %v114_v36 = vadd.f32 %v113_v27, %v112_v30  ;;  %v192_v27 = vsel %vm79_vm0, %v69_v16, 0.0  ;;  %v137_v35 = vsel %vm79_vm0, %v44_v25, 0.0  ;;  %v75_v50 = vld [vmem:[%s663_s0 + $0x1e0] sm:$0xff]  ;;  %s314_s10 = sshll.u32 %s367_s9, 4  ;;  %s315_s10 = int_to_ptr.vmem [resolvable:$true] %s314_s10 }
  0x25   :  { %v173_v40 = vadd.f32 %v172_v31, %v171_v34  ;;  %v45_v31 = vld [vmem:[%s663_s0 + $0xf0] sm:$0xff]  ;;  %v72_v34 = vld [vmem:[%s663_s0 + $0x1c8] sm:$0xff]  ;;  %s343_s11 = scalar_lea.vmem %s315_s10, 32  ;;  %p348_p1 = scmp.lt.s32.totalorder %s315_s10, %s315_s10 }
  0x26   :  { %v116_v42 = vadd.f32 %v115_v33, %v114_v36  ;;  %v194_v33 = vsel %vm79_vm0, %v70_v22, 0.0  ;;  %v139_v41 = vsel %vm79_vm0, %v45_v31, 0.0  ;;  %v198_v44 = vsel %vm79_vm0, %v72_v34, 0.0  ;;  %p344_p0 = scmp.ne.s32.totalorder %s315_s10, %s343_s11  ;;  %p349_p2 = scmp.lt.s32.totalorder %s343_s11, %s343_s11 }
  0x27   :  { %v175_v46 = vadd.f32 %v174_v37, %v173_v40  ;;  %v46_v37 = vld [vmem:[%s663_s0 + $0xf8] sm:$0xff]  ;;  %v73_v40 = vld [vmem:[%s663_s0 + $0x1d0] sm:$0xff] }
  0x28   :  { %v118_v48 = vadd.f32 %v117_v39, %v116_v42  ;;  %v196_v39 = vsel %vm79_vm0, %v71_v28, 0.0  ;;  %p350_p3 = por %p349_p2, %p348_p1 }
  0x29   :  { %v177_v52 = vadd.f32 %v176_v43, %v175_v46  ;;  %v141_v46 = vsel %vm79_vm0, %v46_v37, 0.0 }
  0x2a   :  { %v120_v54 = vadd.f32 %v119_v45, %v118_v48  ;;  %v74_v45 = vld [vmem:[%s663_s0 + $0x1d8] sm:$0xff]  ;;  %p351_p4 = pnand %p350_p3, %p344_p0 }
  0x2b   :  { %v179_v58 = vadd.f32 %v178_v49, %v177_v52  ;;  %v200_v49 = vsel %vm79_vm0, %v73_v40, 0.0  ;;  %v202_v53 = vsel %vm79_vm0, %v74_v45, 0.0 }
  0x2c   :  { %v122_v60 = vadd.f32 %v121_v51, %v120_v54  ;;  %v76_v54 = vld [vmem:[%s663_s0 + $0x1e8] sm:$0xff] }
  0x2d   :  { %v181_v0 = vadd.f32 %v180_v55, %v179_v58  ;;  %v77_v58 = vld [vmem:[%s663_s0 + $0x1f0] sm:$0xff] }
  0x2e   :  { %v124_v2 = vadd.f32 %v123_v57, %v122_v60  ;;  %v204_v57 = vsel %vm79_vm0, %v75_v50, 0.0 }
  0x2f   :  { %v183_v6 = vadd.f32 %v182_v61, %v181_v0  ;;  %v206_v61 = vsel %vm79_vm0, %v76_v54, 0.0  ;;  %v208_v0 = vsel %vm79_vm0, %v77_v58, 0.0 }
  0x30   :  { %v126_v8 = vadd.f32 %v125_v63, %v124_v2 }
  0x31   :  { %v185_v12 = vadd.f32 %v184_v3, %v183_v6  ;;  %v210_v3 = vsel %vm79_vm0, %v78_v62, 0.0 }
  0x32   :  { %v128_v14 = vadd.f32 %v127_v5, %v126_v8 }
  0x33   :  { %v187_v18 = vadd.f32 %v186_v9, %v185_v12 }
  0x34   :  { %v130_v20 = vadd.f32 %v129_v11, %v128_v14 }
  0x35   :  { %v189_v24 = vadd.f32 %v188_v15, %v187_v18  ;;  %v322_v18 = vld [vmem:[%s665_s2] ss:$0 sm:$0xff] }
  0x36   :  { %v132_v26 = vadd.f32 %v131_v17, %v130_v20 }
  0x37   :  { %v191_v30 = vadd.f32 %v190_v21, %v189_v24 }
  0x38   :  { %v134_v32 = vadd.f32 %v133_v23, %v132_v26 }
  0x39   :  { %v193_v36 = vadd.f32 %v192_v27, %v191_v30 }
  0x3a   :  { %v136_v38 = vadd.f32 %v135_v29, %v134_v32 }
  0x3b   :  { %v195_v42 = vadd.f32 %v194_v33, %v193_v36 }
  0x3c   :  { %v138_v43 = vadd.f32 %v137_v35, %v136_v38 }
  0x3d   :  { %v197_v47 = vadd.f32 %v196_v39, %v195_v42 }
  0x3e   :  { %v140_v48 = vadd.f32 %v139_v41, %v138_v43 }
  0x3f   :  { %v199_v51 = vadd.f32 %v198_v44, %v197_v47 }
  0x40   :  { %v142_v52 = vadd.f32 %v141_v46, %v140_v48 }
  0x41   :  { %v201_v55 = vadd.f32 %v200_v49, %v199_v51 }
  0x42   :  { %v143_v56 = vrot.slane %v142_v52, 4 }
  0x43   :  { %v203_v59 = vadd.f32 %v202_v53, %v201_v55 }
  0x44   :  { %v144_v60 = vadd.f32 %v143_v56, %v142_v52 }
  0x45   :  { %v205_v63 = vadd.f32 %v204_v57, %v203_v59 }
  0x46   :  { %v145_v1 = vrot.slane %v144_v60, 2 }
  0x47   :  { %v207_v2 = vadd.f32 %v206_v61, %v205_v63 }
  0x48   :  { %v146_v5 = vadd.f32 %v145_v1, %v144_v60 }
  0x49   :  { %v209_v4 = vadd.f32 %v208_v0, %v207_v2 }
  0x4a   :  { %v147_v8 = vrot.slane %v146_v5, 1 }
  0x4b   :  { %v211_v6 = vadd.f32 %v210_v3, %v209_v4 }
  0x4c   :  { %v148_v11 = vadd.f32 %v147_v8, %v146_v5 }
  0x4d   :  { %v212_v7 = vrot.slane %v211_v6, 4 }
  0x4e   :  { %v218_v15 = vmul.f32 0.00390625, %v148_v11 }
  0x4f   :  { %v213_v9 = vadd.f32 %v212_v7, %v211_v6 }
  0x51   :  { %v214_v10 = vrot.slane %v213_v9, 2 }
  0x53   :  { %v215_v12 = vadd.f32 %v214_v10, %v213_v9 }
  0x55   :  { %v216_v13 = vrot.slane %v215_v12, 1 }
  0x57   :  { %v217_v14 = vadd.f32 %v216_v13, %v215_v12 }
  0x59   :  { %v219_v16 = vmul.f32 0.00390625, %v217_v14 }
  0x5b   :  { %v234_v17 = vsel %vm233_vm2, %v219_v16, %v218_v15 }
  0x5c   :  { %338 = vmatmul.mubr.msk.f32.vlgmr.msra.gmra.mxu0 %vm79_vm0, %v234_v17 }
 0x11c   :  { %v303_v19 = vpop.f32.mrf.mxu0 }
 0x11d   :  { %v304_v20 = vadd.f32 %v322_v18, %v303_v19 }
 0x11e   :  { %v339_v21 = vpop.f32.mrf.mxu0 }
 0x11f   :  { %307 = vst [vmem:[#allocation2] sm:$0x3] %v304_v20 }
 0x120   :  { %354 = shalt.err (!%p351_p4)
}
 0x121   :  { %317 = dma.vmem_to_hbm [thread:$0]  %s315_s10, 32, %s666_s3, [#allocation3]  }
 0x122   :  { %363 = dma.done.wait [#allocation3], 32  }
 0x123   :  { %364 = vsyncadd [#allocation3], 4294967264 }
 0x124   :  { %321 = vsyncpa [#allocation3], 1 }

</bundles_post_ra>
